<compile_context>
chip_gen: v6e
topology: v6e:2x2x1
jax: 0.10.0
libtpu: 0.0.40
codegen_flags: <defaults>
</compile_context>

<pallas_src>
import jax
import jax.numpy as jnp
from jax.experimental import pallas as pl
from jax.experimental.pallas import tpu as pltpu


# --------------------------------------------------------------------------
# Fused Pallas kernel: one invocation runs all num_layers ConvBlocks
# (virtual-node add + GINEConv(MLP) + folded-BN (+ReLU) + virtual-node MLP).
# --------------------------------------------------------------------------
def make_gnn_kernel(num_layers, emb_dim, mxu_dtype):
    D = emb_dim

    def gnn_kernel(coef_ref,                    # SMEM (L,)   f32 : 1 + eps per layer
                   h0_ref,                      # (N, D)      f32 : initial node emb
                   src_oh_ref,                  # (E, N) mxu_dtype: one-hot gather
                   dst_oh_t_ref,                # (N, E) mxu_dtype: one-hot scatter
                   e_ref,                       # (L, E, D)   f32 : edge emb per layer
                   w1_ref,                      # (L, 2, D, 2D)   : [l,0]=GIN w1, [l,1]=VN wv1
                   w2_ref,                      # (L, 2, 2D, D)   : [l,0]=GIN w2, [l,1]=VN wv2
                   bias_ref,                    # (L, 4, 2D)  f32 : rows [b1, bv1, b2|0, bv2|0]
                   h_out_ref):                  # (N, D)      f32 : output node features
        src_oh = src_oh_ref[...]
        dst_oh_t = dst_oh_t_ref[...]
        h = h0_ref[...]
        vx = jnp.zeros((1, D), jnp.float32)

        # Static Python unroll: num_layers is small & static, so all ref slices
        # below are static (zero cost) and the last-layer specialization is a
        # trace-time decision (no per-layer jnp.where select).
        for l in range(num_layers):
            last = (l == num_layers - 1)
            bias = bias_ref[l]                       # (4, 2D) f32
            b1, bv1 = bias[0:1, :], bias[1:2, :]
            b2, bv2 = bias[2:3, 0:D], bias[3:4, 0:D]

            # VirtualNode.update_node_emb (single graph -> batch_id == 0)
            hh = h + vx

            # GINEConv: m_e = relu(h[src(e)] + edge_emb[e]);
            #           agg_i = sum_{dst(e)=i} m_e   (dense one-hot on MXU)
            h_src = jnp.dot(src_oh, hh.astype(mxu_dtype),
                            preferred_element_type=jnp.float32)
            m = jnp.maximum(h_src + e_ref[l], 0.0)
            agg = jnp.dot(dst_oh_t, m.astype(mxu_dtype),
                          preferred_element_type=jnp.float32)
            z = coef_ref[l] * hh + agg               # coef = 1 + eps (SMEM scalar)

            # GIN apply MLP with BN folded: Linear+BN -> ReLU -> Linear+(ConvBlock BN)
            t = jnp.maximum(
                jnp.dot(z.astype(mxu_dtype), w1_ref[l, 0],
                        preferred_element_type=jnp.float32) + b1, 0.0)
            out = jnp.dot(t.astype(mxu_dtype), w2_ref[l, 0],
                          preferred_element_type=jnp.float32) + b2

            if not last:
                # ConvBlock activation (ReLU on all but last layer); dropout = identity.
                out = jnp.maximum(out, 0.0)
                # VirtualNode.update_vn_emb (sum-pool + folded MLP, residual).
                # Skipped on the last layer (result unused by mode='last').
                # NOTE: the two (1, .) matmuls are mostly MXU pipeline fill on
                # v5e/v6e; negligible at this size.
                pooled = jnp.sum(out, axis=0, keepdims=True) + vx   # linear == Identity
                v = jnp.maximum(
                    jnp.dot(pooled.astype(mxu_dtype), w1_ref[l, 1],
                            preferred_element_type=jnp.float32) + bv1, 0.0)
                v = jnp.maximum(
                    jnp.dot(v.astype(mxu_dtype), w2_ref[l, 1],
                            preferred_element_type=jnp.float32) + bv2, 0.0)
                vx = vx + v                                          # residual
            h = out

        h_out_ref[...] = h

    return gnn_kernel


def gnn_forward_pallas(h0, src_oh, dst_oh_t, e_emb, coef,
                       w1_all, w2_all, bias_all, mxu_dtype):
    N, D = h0.shape
    L = int(coef.shape[0])
    kernel = make_gnn_kernel(L, D, mxu_dtype)

    vmem = pl.BlockSpec(memory_space=pltpu.MemorySpace.VMEM)
    smem = pl.BlockSpec(memory_space=pltpu.MemorySpace.SMEM)
    return pl.pallas_call(
        kernel,
        out_shape=jax.ShapeDtypeStruct((N, D), jnp.float32),
        in_specs=[smem,          # coef (L,)
                  vmem,          # h0
                  vmem,          # src_oh
                  vmem,          # dst_oh_t
                  vmem,          # e_emb
                  vmem,          # w1_all
                  vmem,          # w2_all
                  vmem],         # bias_all
        out_specs=vmem,
    )(coef, h0, src_oh, dst_oh_t, e_emb, w1_all, w2_all, bias_all)


# --------------------------------------------------------------------------
# Plain-JAX glue: embeddings, BN folding, parameter packing, driver, reference.
# --------------------------------------------------------------------------
def categorical_embedding(tables, feats):
    out = jnp.zeros((feats.shape[0], tables[0].shape[1]), jnp.float32)
    for c, tab in enumerate(tables):
        out = out + tab[feats[:, c]]
    return out


def fold_bn(gamma, beta, mean, var, eps=1e-5):
    scale = gamma / jnp.sqrt(var + eps)
    shift = beta - mean * scale
    return scale, shift


def fold_layer(lp):
    """Fold eval-mode BatchNorm into the preceding Linear weights/biases."""
    w1f = lp['w1'] * lp['bn1s']
    b1f = lp['b1'] * lp['bn1s'] + lp['bn1b']
    w2f = lp['w2'] * lp['bns']
    b2f = lp['b2'] * lp['bns'] + lp['bnb']
    wv1f = lp['wv1'] * lp['bnv1s']
    bv1f = lp['bv1'] * lp['bnv1s'] + lp['bnv1b']
    wv2f = lp['wv2'] * lp['bnv2s']
    bv2f = lp['bv2'] * lp['bnv2s'] + lp['bnv2b']
    coef = 1.0 + lp['eps'][0, 0]
    return coef, w1f, b1f, w2f, b2f, wv1f, bv1f, wv2f, bv2f


def init_linear(key, in_dim, out_dim):
    k1, k2 = jax.random.split(key)
    w = 0.1 * jax.random.normal(k1, (in_dim, out_dim), jnp.float32)
    b = 0.1 * jax.random.normal(k2, (1, out_dim), jnp.float32)
    return w, b


def init_bn(key, dim):
    k1, k2, k3, k4 = jax.random.split(key, 4)
    gamma = 1.0 + 0.1 * jax.random.normal(k1, (1, dim), jnp.float32)
    beta = 0.1 * jax.random.normal(k2, (1, dim), jnp.float32)
    mean = 0.1 * jax.random.normal(k3, (1, dim), jnp.float32)
    var = jax.random.uniform(k4, (1, dim), jnp.float32, minval=0.5, maxval=1.5)
    return fold_bn(gamma, beta, mean, var)


def init_layer_params(key, D):
    ks = jax.random.split(key, 8)
    lp = {}
    lp['eps'] = jnp.zeros((1, 1), jnp.float32)          # GINEConv learn_eps init 0
    lp['w1'], lp['b1'] = init_linear(ks[0], D, 2 * D)   # GIN MLP
    lp['bn1s'], lp['bn1b'] = init_bn(ks[1], 2 * D)
    lp['w2'], lp['b2'] = init_linear(ks[2], 2 * D, D)
    lp['bns'], lp['bnb'] = init_bn(ks[3], D)            # ConvBlock batch_norm
    lp['wv1'], lp['bv1'] = init_linear(ks[4], D, 2 * D) # virtual node MLP
    lp['bnv1s'], lp['bnv1b'] = init_bn(ks[5], 2 * D)
    lp['wv2'], lp['bv2'] = init_linear(ks[6], 2 * D, D)
    lp['bnv2s'], lp['bnv2b'] = init_bn(ks[7], D)
    return lp


def model_forward(node_tables, edge_tables_per_layer, layer_params, x, w, src, dst,
                  mxu_dtype=jnp.bfloat16):
    # mode == 'last'; node_degree path dead in reference (hasattr checks wrong name)
    N = x.shape[0]
    D = node_tables[0].shape[1]
    h0 = categorical_embedding(node_tables, x)
    src_oh = jax.nn.one_hot(src, N, dtype=mxu_dtype)          # (E, N), 0/1 exact
    dst_oh_t = jax.nn.one_hot(dst, N, dtype=mxu_dtype).T      # (N, E)
    e_emb = jnp.stack(
        [categorical_embedding(tabs, w) for tabs in edge_tables_per_layer], 0)

    folded = [fold_layer(lp) for lp in layer_params]
    coef = jnp.stack([f[0] for f in folded]).astype(jnp.float32)        # (L,)
    # Stacked weight slabs: [l, 0] = GIN MLP, [l, 1] = virtual-node MLP.
    w1_all = jnp.stack([jnp.stack([f[1], f[5]], 0) for f in folded], 0).astype(mxu_dtype)
    w2_all = jnp.stack([jnp.stack([f[3], f[7]], 0) for f in folded], 0).astype(mxu_dtype)
    # Single bias slab per layer: rows [b1 (2D), bv1 (2D), b2|0 (2D), bv2|0 (2D)].
    pad = lambda b: jnp.concatenate([b, jnp.zeros_like(b)], axis=-1)    # (1,D)->(1,2D)
    bias_all = jnp.stack(
        [jnp.concatenate([f[2], f[6], pad(f[4]), pad(f[8])], 0) for f in folded], 0)

    return gnn_forward_pallas(h0, src_oh, dst_oh_t, e_emb, coef,
                              w1_all, w2_all, bias_all, mxu_dtype)


def model_forward_ref(node_tables, edge_tables_per_layer, layer_params, x, w, src, dst):
    N = x.shape[0]
    D = node_tables[0].shape[1]
    h = categorical_embedding(node_tables, x)
    vx = jnp.zeros((1, D), jnp.float32)
    num_layers = len(layer_params)
    for layer in range(num_layers):
        lp = layer_params[layer]
        e_emb = categorical_embedding(edge_tables_per_layer[layer], w)
        hh = h + vx
        m = jnp.maximum(hh[src] + e_emb, 0.0)
        agg = jax.ops.segment_sum(m, dst, num_segments=N)
        z = (1.0 + lp['eps']) * hh + agg
        t = jnp.maximum((z @ lp['w1'] + lp['b1']) * lp['bn1s'] + lp['bn1b'], 0.0)
        out = (t @ lp['w2'] + lp['b2']) * lp['bns'] + lp['bnb']
        if layer != num_layers - 1:
            out = jnp.maximum(out, 0.0)
        pooled = jnp.sum(out, axis=0, keepdims=True) + vx
        v = jnp.maximum((pooled @ lp['wv1'] + lp['bv1']) * lp['bnv1s'] + lp['bnv1b'], 0.0)
        v = jnp.maximum((v @ lp['wv2'] + lp['bv2']) * lp['bnv2s'] + lp['bnv2b'], 0.0)
        h, vx = out, vx + v
    return h


if __name__ == "__main__":
    # Model config (small): emb_dim=32, num_layers=2, mode='last'
    D = 32
    num_layers = 2
    num_node_emb_list = [7, 5]
    num_edge_emb_list = [4, 3]
    N, E = 16, 32                                   # nodes / edges, single graph

    key = jax.random.PRNGKey(0)
    k_nodes, k_edges, k_layers, k_x, k_w, k_src, k_dst = jax.random.split(key, 7)

    node_tables = [0.1 * jax.random.normal(k, (n, D), jnp.float32)
                   for k, n in zip(jax.random.split(k_nodes, len(num_node_emb_list)),
                                   num_node_emb_list)]
    edge_tables_per_layer = []
    for kl in jax.random.split(k_edges, num_layers):
        edge_tables_per_layer.append(
            [0.1 * jax.random.normal(k, (n, D), jnp.float32)
             for k, n in zip(jax.random.split(kl, len(num_edge_emb_list)),
                             num_edge_emb_list)])
    layer_params = [init_layer_params(k, D) for k in jax.random.split(k_layers, num_layers)]

    x = jnp.stack([jax.random.randint(k, (N,), 0, n, jnp.int32)
                   for k, n in zip(jax.random.split(k_x, len(num_node_emb_list)),
                                   num_node_emb_list)], axis=-1)          # (N, 2)
    w = jnp.stack([jax.random.randint(k, (E,), 0, n, jnp.int32)
                   for k, n in zip(jax.random.split(k_w, len(num_edge_emb_list)),
                                   num_edge_emb_list)], axis=-1)          # (E, 2)
    src = jax.random.randint(k_src, (E,), 0, N, jnp.int32)
    dst = jax.random.randint(k_dst, (E,), 0, N, jnp.int32)

    # TODO(synk): training-mode Dropout / batch-stat BatchNorm are stochastic /
    # batch-dependent; eval-mode (identity / folded running stats) is implemented.
    ref = model_forward_ref(node_tables, edge_tables_per_layer, layer_params,
                            x, w, src, dst)

    # f32-MXU-input path: tight structural check of the fused kernel.
    out_f32 = jax.block_until_ready(
        model_forward(node_tables, edge_tables_per_layer, layer_params,
                      x, w, src, dst, mxu_dtype=jnp.float32))
    assert out_f32.shape == (N, D)
    assert jnp.allclose(out_f32, ref, atol=1e-4, rtol=1e-4), "f32 path mismatch vs reference"

    # bf16-MXU-input path (perf default): accumulation stays f32, so the only
    # difference vs the f32 reference is bf16 rounding of MXU inputs.
    out = jax.block_until_ready(
        model_forward(node_tables, edge_tables_per_layer, layer_params,
                      x, w, src, dst, mxu_dtype=jnp.bfloat16))
    assert out.shape == (N, D)
    assert jnp.allclose(out, ref, atol=5e-2, rtol=5e-2), "bf16 path mismatch vs reference"

    print("KERNEL_OK")
</pallas_src>

<mosaic_0001>
module attributes {stable_mosaic.version = 11 : i64} {
  func.func @gnn_kernel(%arg0: memref<2xf32, #tpu.memory_space<smem>>, %arg1: memref<16x32xf32, #tpu.memory_space<vmem>>, %arg2: memref<32x16xf32, #tpu.memory_space<vmem>>, %arg3: memref<16x32xf32, #tpu.memory_space<vmem>>, %arg4: memref<2x32x32xf32, #tpu.memory_space<vmem>>, %arg5: memref<2x2x32x64xf32, #tpu.memory_space<vmem>>, %arg6: memref<2x2x64x32xf32, #tpu.memory_space<vmem>>, %arg7: memref<2x4x64xf32, #tpu.memory_space<vmem>>, %arg8: memref<16x32xf32, #tpu.memory_space<vmem>>) attributes {dimension_semantics = [], scalar_prefetch = 0 : i64, scratch_operands = 0 : i64, tpu.core_type = #tpu.core_type<tc>} {
    %c0 = arith.constant 0 : index
    %c0_0 = arith.constant 0 : index
    %0 = vector.load %arg2[%c0, %c0_0] : memref<32x16xf32, #tpu.memory_space<vmem>>, vector<32x16xf32>
    %c0_1 = arith.constant 0 : index
    %c0_2 = arith.constant 0 : index
    %1 = vector.load %arg3[%c0_1, %c0_2] : memref<16x32xf32, #tpu.memory_space<vmem>>, vector<16x32xf32>
    %c0_3 = arith.constant 0 : index
    %c0_4 = arith.constant 0 : index
    %2 = vector.load %arg1[%c0_3, %c0_4] : memref<16x32xf32, #tpu.memory_space<vmem>>, vector<16x32xf32>
    %cst = arith.constant 0.000000e+00 : f32
    %3 = vector.broadcast %cst : f32 to vector<1x32xf32>
    %c0_5 = arith.constant 0 : index
    %c0_6 = arith.constant 0 : index
    %c0_7 = arith.constant 0 : index
    %4 = vector.load %arg7[%c0_5, %c0_6, %c0_7] : memref<2x4x64xf32, #tpu.memory_space<vmem>>, vector<1x4x64xf32>
    %5 = vector.shape_cast %4 : vector<1x4x64xf32> to vector<4x64xf32>
    %6 = vector.extract_strided_slice %5 {offsets = [0, 0], sizes = [1, 64], strides = [1, 1]} : vector<4x64xf32> to vector<1x64xf32>
    %7 = vector.extract_strided_slice %5 {offsets = [1, 0], sizes = [1, 64], strides = [1, 1]} : vector<4x64xf32> to vector<1x64xf32>
    %8 = vector.extract_strided_slice %5 {offsets = [2, 0], sizes = [1, 32], strides = [1, 1]} : vector<4x64xf32> to vector<1x32xf32>
    %9 = vector.extract_strided_slice %5 {offsets = [3, 0], sizes = [1, 32], strides = [1, 1]} : vector<4x64xf32> to vector<1x32xf32>
    %10 = vector.broadcast %3 : vector<1x32xf32> to vector<16x32xf32>
    %11 = arith.addf %2, %10 : vector<16x32xf32>
    %cst_8 = arith.constant dense<0.000000e+00> : vector<32x32xf32>
    %12 = tpu.matmul %0, %11, %cst_8 {dimension_numbers = #tpu.dot_dimension_numbers<[1], [0], [0], [1], [0, 0, 1, 1], [], []>} : vector<32x16xf32>, vector<16x32xf32>, vector<32x32xf32> -> vector<32x32xf32>
    %c0_9 = arith.constant 0 : index
    %c0_10 = arith.constant 0 : index
    %c0_11 = arith.constant 0 : index
    %13 = vector.load %arg4[%c0_9, %c0_10, %c0_11] : memref<2x32x32xf32, #tpu.memory_space<vmem>>, vector<1x32x32xf32>
    %14 = vector.shape_cast %13 : vector<1x32x32xf32> to vector<32x32xf32>
    %15 = arith.addf %12, %14 : vector<32x32xf32>
    %cst_12 = arith.constant 0.000000e+00 : f32
    %16 = vector.broadcast %cst_12 : f32 to vector<32x32xf32>
    %17 = arith.maximumf %15, %16 : vector<32x32xf32>
    %cst_13 = arith.constant dense<0.000000e+00> : vector<16x32xf32>
    %18 = tpu.matmul %1, %17, %cst_13 {dimension_numbers = #tpu.dot_dimension_numbers<[1], [0], [0], [1], [0, 0, 1, 1], [], []>} : vector<16x32xf32>, vector<32x32xf32>, vector<16x32xf32> -> vector<16x32xf32>
    %c0_14 = arith.constant 0 : index
    %19 = memref.load %arg0[%c0_14] : memref<2xf32, #tpu.memory_space<smem>>
    %20 = vector.broadcast %19 : f32 to vector<16x32xf32>
    %21 = arith.mulf %20, %11 : vector<16x32xf32>
    %22 = arith.addf %21, %18 : vector<16x32xf32>
    %c0_15 = arith.constant 0 : index
    %c0_16 = arith.constant 0 : index
    %c0_17 = arith.constant 0 : index
    %c0_18 = arith.constant 0 : index
    %23 = vector.load %arg5[%c0_15, %c0_16, %c0_17, %c0_18] : memref<2x2x32x64xf32, #tpu.memory_space<vmem>>, vector<1x1x32x64xf32>
    %24 = vector.shape_cast %23 : vector<1x1x32x64xf32> to vector<32x64xf32>
    %cst_19 = arith.constant dense<0.000000e+00> : vector<16x64xf32>
    %25 = tpu.matmul %22, %24, %cst_19 {dimension_numbers = #tpu.dot_dimension_numbers<[1], [0], [0], [1], [0, 0, 1, 1], [], []>} : vector<16x32xf32>, vector<32x64xf32>, vector<16x64xf32> -> vector<16x64xf32>
    %26 = vector.broadcast %6 : vector<1x64xf32> to vector<16x64xf32>
    %27 = arith.addf %25, %26 : vector<16x64xf32>
    %cst_20 = arith.constant 0.000000e+00 : f32
    %28 = vector.broadcast %cst_20 : f32 to vector<16x64xf32>
    %29 = arith.maximumf %27, %28 : vector<16x64xf32>
    %c0_21 = arith.constant 0 : index
    %c0_22 = arith.constant 0 : index
    %c0_23 = arith.constant 0 : index
    %c0_24 = arith.constant 0 : index
    %30 = vector.load %arg6[%c0_21, %c0_22, %c0_23, %c0_24] : memref<2x2x64x32xf32, #tpu.memory_space<vmem>>, vector<1x1x64x32xf32>
    %31 = vector.shape_cast %30 : vector<1x1x64x32xf32> to vector<64x32xf32>
    %cst_25 = arith.constant dense<0.000000e+00> : vector<16x32xf32>
    %32 = tpu.matmul %29, %31, %cst_25 {dimension_numbers = #tpu.dot_dimension_numbers<[1], [0], [0], [1], [0, 0, 1, 1], [], []>} : vector<16x64xf32>, vector<64x32xf32>, vector<16x32xf32> -> vector<16x32xf32>
    %33 = vector.broadcast %8 : vector<1x32xf32> to vector<16x32xf32>
    %34 = arith.addf %32, %33 : vector<16x32xf32>
    %cst_26 = arith.constant 0.000000e+00 : f32
    %35 = vector.broadcast %cst_26 : f32 to vector<16x32xf32>
    %36 = arith.maximumf %34, %35 : vector<16x32xf32>
    %cst_27 = arith.constant dense<0.000000e+00> : vector<32xf32>
    %37 = vector.multi_reduction <add>, %36, %cst_27 [0] : vector<16x32xf32> to vector<32xf32>
    %38 = vector.shape_cast %37 : vector<32xf32> to vector<1x32xf32>
    %39 = arith.addf %38, %3 : vector<1x32xf32>
    %c0_28 = arith.constant 0 : index
    %c1 = arith.constant 1 : index
    %c0_29 = arith.constant 0 : index
    %c0_30 = arith.constant 0 : index
    %40 = vector.load %arg5[%c0_28, %c1, %c0_29, %c0_30] : memref<2x2x32x64xf32, #tpu.memory_space<vmem>>, vector<1x1x32x64xf32>
    %41 = vector.shape_cast %40 : vector<1x1x32x64xf32> to vector<32x64xf32>
    %cst_31 = arith.constant dense<0.000000e+00> : vector<1x64xf32>
    %42 = tpu.matmul %39, %41, %cst_31 {dimension_numbers = #tpu.dot_dimension_numbers<[1], [0], [0], [1], [0, 0, 1, 1], [], []>} : vector<1x32xf32>, vector<32x64xf32>, vector<1x64xf32> -> vector<1x64xf32>
    %43 = arith.addf %42, %7 : vector<1x64xf32>
    %cst_32 = arith.constant 0.000000e+00 : f32
    %44 = vector.broadcast %cst_32 : f32 to vector<1x64xf32>
    %45 = arith.maximumf %43, %44 : vector<1x64xf32>
    %c0_33 = arith.constant 0 : index
    %c1_34 = arith.constant 1 : index
    %c0_35 = arith.constant 0 : index
    %c0_36 = arith.constant 0 : index
    %46 = vector.load %arg6[%c0_33, %c1_34, %c0_35, %c0_36] : memref<2x2x64x32xf32, #tpu.memory_space<vmem>>, vector<1x1x64x32xf32>
    %47 = vector.shape_cast %46 : vector<1x1x64x32xf32> to vector<64x32xf32>
    %cst_37 = arith.constant dense<0.000000e+00> : vector<1x32xf32>
    %48 = tpu.matmul %45, %47, %cst_37 {dimension_numbers = #tpu.dot_dimension_numbers<[1], [0], [0], [1], [0, 0, 1, 1], [], []>} : vector<1x64xf32>, vector<64x32xf32>, vector<1x32xf32> -> vector<1x32xf32>
    %49 = arith.addf %48, %9 : vector<1x32xf32>
    %cst_38 = arith.constant 0.000000e+00 : f32
    %50 = vector.broadcast %cst_38 : f32 to vector<1x32xf32>
    %51 = arith.maximumf %49, %50 : vector<1x32xf32>
    %52 = arith.addf %3, %51 : vector<1x32xf32>
    %c1_39 = arith.constant 1 : index
    %c0_40 = arith.constant 0 : index
    %c0_41 = arith.constant 0 : index
    %53 = vector.load %arg7[%c1_39, %c0_40, %c0_41] : memref<2x4x64xf32, #tpu.memory_space<vmem>>, vector<1x4x64xf32>
    %54 = vector.shape_cast %53 : vector<1x4x64xf32> to vector<4x64xf32>
    %55 = vector.extract_strided_slice %54 {offsets = [0, 0], sizes = [1, 64], strides = [1, 1]} : vector<4x64xf32> to vector<1x64xf32>
    %56 = vector.extract_strided_slice %54 {offsets = [2, 0], sizes = [1, 32], strides = [1, 1]} : vector<4x64xf32> to vector<1x32xf32>
    %57 = vector.broadcast %52 : vector<1x32xf32> to vector<16x32xf32>
    %58 = arith.addf %36, %57 : vector<16x32xf32>
    %cst_42 = arith.constant dense<0.000000e+00> : vector<32x32xf32>
    %59 = tpu.matmul %0, %58, %cst_42 {dimension_numbers = #tpu.dot_dimension_numbers<[1], [0], [0], [1], [0, 0, 1, 1], [], []>} : vector<32x16xf32>, vector<16x32xf32>, vector<32x32xf32> -> vector<32x32xf32>
    %c1_43 = arith.constant 1 : index
    %c0_44 = arith.constant 0 : index
    %c0_45 = arith.constant 0 : index
    %60 = vector.load %arg4[%c1_43, %c0_44, %c0_45] : memref<2x32x32xf32, #tpu.memory_space<vmem>>, vector<1x32x32xf32>
    %61 = vector.shape_cast %60 : vector<1x32x32xf32> to vector<32x32xf32>
    %62 = arith.addf %59, %61 : vector<32x32xf32>
    %cst_46 = arith.constant 0.000000e+00 : f32
    %63 = vector.broadcast %cst_46 : f32 to vector<32x32xf32>
    %64 = arith.maximumf %62, %63 : vector<32x32xf32>
    %cst_47 = arith.constant dense<0.000000e+00> : vector<16x32xf32>
    %65 = tpu.matmul %1, %64, %cst_47 {dimension_numbers = #tpu.dot_dimension_numbers<[1], [0], [0], [1], [0, 0, 1, 1], [], []>} : vector<16x32xf32>, vector<32x32xf32>, vector<16x32xf32> -> vector<16x32xf32>
    %c1_48 = arith.constant 1 : index
    %66 = memref.load %arg0[%c1_48] : memref<2xf32, #tpu.memory_space<smem>>
    %67 = vector.broadcast %66 : f32 to vector<16x32xf32>
    %68 = arith.mulf %67, %58 : vector<16x32xf32>
    %69 = arith.addf %68, %65 : vector<16x32xf32>
    %c1_49 = arith.constant 1 : index
    %c0_50 = arith.constant 0 : index
    %c0_51 = arith.constant 0 : index
    %c0_52 = arith.constant 0 : index
    %70 = vector.load %arg5[%c1_49, %c0_50, %c0_51, %c0_52] : memref<2x2x32x64xf32, #tpu.memory_space<vmem>>, vector<1x1x32x64xf32>
    %71 = vector.shape_cast %70 : vector<1x1x32x64xf32> to vector<32x64xf32>
    %cst_53 = arith.constant dense<0.000000e+00> : vector<16x64xf32>
    %72 = tpu.matmul %69, %71, %cst_53 {dimension_numbers = #tpu.dot_dimension_numbers<[1], [0], [0], [1], [0, 0, 1, 1], [], []>} : vector<16x32xf32>, vector<32x64xf32>, vector<16x64xf32> -> vector<16x64xf32>
    %73 = vector.broadcast %55 : vector<1x64xf32> to vector<16x64xf32>
    %74 = arith.addf %72, %73 : vector<16x64xf32>
    %cst_54 = arith.constant 0.000000e+00 : f32
    %75 = vector.broadcast %cst_54 : f32 to vector<16x64xf32>
    %76 = arith.maximumf %74, %75 : vector<16x64xf32>
    %c1_55 = arith.constant 1 : index
    %c0_56 = arith.constant 0 : index
    %c0_57 = arith.constant 0 : index
    %c0_58 = arith.constant 0 : index
    %77 = vector.load %arg6[%c1_55, %c0_56, %c0_57, %c0_58] : memref<2x2x64x32xf32, #tpu.memory_space<vmem>>, vector<1x1x64x32xf32>
    %78 = vector.shape_cast %77 : vector<1x1x64x32xf32> to vector<64x32xf32>
    %cst_59 = arith.constant dense<0.000000e+00> : vector<16x32xf32>
    %79 = tpu.matmul %76, %78, %cst_59 {dimension_numbers = #tpu.dot_dimension_numbers<[1], [0], [0], [1], [0, 0, 1, 1], [], []>} : vector<16x64xf32>, vector<64x32xf32>, vector<16x32xf32> -> vector<16x32xf32>
    %80 = vector.broadcast %56 : vector<1x32xf32> to vector<16x32xf32>
    %81 = arith.addf %79, %80 : vector<16x32xf32>
    %c0_60 = arith.constant 0 : index
    %c0_61 = arith.constant 0 : index
    %82 = vector.load %arg8[%c0_60, %c0_61] : memref<16x32xf32, #tpu.memory_space<vmem>>, vector<16x32xf32>
    tpu.vector_store %arg8[%c0_60, %c0_61], %81 {strides = array<i32>} : memref<16x32xf32, #tpu.memory_space<vmem>>, vector<16x32xf32>,
    return
  }
}

</mosaic_0001>

<bundles_post_ra>
// kernel: tpu_custom_call.1
= control target key start
LH: loop header
LB: loop body
LE: loop exit
PB: predicated region body
PF: predicated region fallthrough
CT: control target
= control target key end

     0   :  { %13 = vsyncpa [#allocation4], 0  ;;  %s1597_s0 = inlined_call_operand.vmem [shape: f32[2], index: 0, kind: input, shape index: {}]   ;;  %s1598_s1 = inlined_call_operand.vmem [shape: f32[16,32], index: 1, kind: input, shape index: {}]   ;;  %s1599_s2 = inlined_call_operand.vmem [shape: f32[32,16], index: 2, kind: input, shape index: {}]   ;;  %s1600_s3 = inlined_call_operand.vmem [shape: f32[16,32], index: 3, kind: input, shape index: {}]   ;;  %s1601_s4 = inlined_call_operand.vmem [shape: f32[2,32,32], index: 4, kind: input, shape index: {}]   ;;  %s1602_s5 = inlined_call_operand.vmem [shape: f32[2,2,32,64], index: 5, kind: input, shape index: {}]   ;;  %s1603_s6 = inlined_call_operand.vmem [shape: f32[2,2,64,32], index: 6, kind: input, shape index: {}]   ;;  %s1604_s7 = inlined_call_operand.vmem [shape: f32[2,4,64], index: 7, kind: input, shape index: {}]   ;;  %s1605_s8 = inlined_call_operand.hbm [shape: f32[16,32], index: 8, kind: output, shape index: {}]  }
   0x1   :  { %14 = vsyncpa [#allocation3], 0  ;;  %s21_s29 = sshll.u32 %s1597_s0, 4  ;;  %s22_s29 = int_to_ptr.vmem [resolvable:$true] %s21_s29 }
   0x2   :  { %s1261_s30 = scalar_lea.vmem %s22_s29, 16  ;;  %p1266_p1 = scmp.lt.s32.totalorder %s22_s29, %s22_s29 }
   0x3   :  { %p1262_p0 = scmp.ne.s32.totalorder %s22_s29, %s1261_s30  ;;  %p1267_p2 = scmp.lt.s32.totalorder %s1261_s30, %s1261_s30 }
   0x5   :  { %p1268_p3 = por %p1267_p2, %p1266_p1 }
   0x7   :  { %p1269_p4 = pnand %p1268_p3, %p1262_p0 }
   0x9   :  { %1272 = shalt.err (!%p1269_p4)
}
   0xa   :  { %s1297_s9 = smov [#allocation2]  }
   0xb   :  { %24 = dma.vmem_to_smem %s22_s29, 16, %s1297_s9, [#allocation4]  }
   0xc   :  { %1293 = dma.done.wait [#allocation4], 16  }
   0xd   :  { %1294 = vsyncadd [#allocation4], 4294967280 }
   0xe   :  { %42 = sfence }
   0xf   :  { %v1354_v0 = vld [vmem:[%s1598_s1 + $0x8] sm:$0xff]  ;;  %v1359_v1 = vld [vmem:[%s1598_s1] sm:$0xff]  ;;  %vm58_vm0 = vcmask 130048   ;;  %v1379_v4 = vld [vmem:[%s1599_s2 + $0x10] sm:$0xff]  ;;  %vm160_vm1 = vcmask 261120   ;;  %s242_s22 = sld [smem:[#allocation2]]  ;;  %v252_v43 = vlaneseq }
  0x10   :  { %v1364_v2 = vld [vmem:[%s1599_s2] sm:$0xff]  ;;  %1123 = vmatprep.subr.mxu0 %v1354_v0  ;;  %v1373_v3 = vld [vmem:[%s1599_s2 + $0x8] sm:$0xff]  ;;  %v1389_v5 = vld [vmem:[%s1599_s2 + $0x18] sm:$0xff]  ;;  %vm351_vm2 = vcmask 523264   ;;  %v1298_v54 = vmov 0.0   ;;  %vm1299_vm3 = vmmov 0  }
  0x11   :  { %1127 = vmatprep.mubr.msk.f32.mxu0 %vm58_vm0, %v1364_v2  ;;  %1124 = vmatpush3.msra.mxu0 %v1354_v0  ;;  %v1396_v6 = vld [vmem:[%s1600_s3] sm:$0xff]  ;;  %v251_v7 = vld [vmem:[%s1602_s5 + $0x18] sm:$0xff]  ;;  %v55_v11 = vld [vmem:[%s1601_s4 + $0x8] sm:$0xff]  ;;  %v1459_v44 = vshrl.u32 %v252_v43, 7  ;;  %s1036_s26 = sld [smem:[#allocation2 + $0x1]] }
  0x12   :  { %1125 = vmatprep.subr.mxu0 %v1359_v1  ;;  %1141 = vmatprep.mubr.msk.f32.mxu1 %vm160_vm1, %v1396_v6  ;;  %v57_v10 = vld [vmem:[%s1601_s4 + $0x18] sm:$0xff]  ;;  %v56_v13 = vld [vmem:[%s1601_s4 + $0x10] sm:$0xff]  ;;  %v54_v15 = vld [vmem:[%s1601_s4] sm:$0xff] }
  0x13   :  { %1126 = vmatpush3.msra.mxu0 %v1359_v1  ;;  %v1418_v24 = vld [vmem:[%s1600_s3 + $0x8] sm:$0xff]  ;;  %v250_v25 = vld [vmem:[%s1602_s5 + $0x10] sm:$0xff]  ;;  %v248_v27 = vld [vmem:[%s1602_s5] sm:$0xff]  ;;  %v1462_v45 = vsub.s32 0, %v1459_v44  ;;  %v349_v59 = vsub.s32 2, %v1459_v44 }
  0x14   :  { %1128 = vmatmul.mubr.msk.f32.vlgmr.msra.gmra.mxu0 %vm58_vm0, %v1373_v3  ;;  %1144 = vmatprep.subr.mxu0 %v251_v7  ;;  %v249_v26 = vld [vmem:[%s1602_s5 + $0x8] sm:$0xff]  ;;  %v346_v28 = vld [vmem:[%s1603_s6 + $0x38] sm:$0xff]  ;;  %v345_v29 = vld [vmem:[%s1603_s6 + $0x30] sm:$0xff] }
  0x15   :  { %1130 = vmatprep.mubr.msk.f32.mxu0 %vm58_vm0, %v1379_v4  ;;  %1145 = vmatpush3.msra.mxu0 %v251_v7  ;;  %v344_v30 = vld [vmem:[%s1603_s6 + $0x28] sm:$0xff]  ;;  %v343_v31 = vld [vmem:[%s1603_s6 + $0x20] sm:$0xff]  ;;  %v243_v32 = vstv %s242_s22  ;;  %v342_v39 = vld [vmem:[%s1603_s6 + $0x18] sm:$0xff] }
  0x16   :  { %1146 = vmatprep.subr.mxu0 %v250_v25  ;;  %v244_v33 = vmul.f32 %v243_v32, %v1359_v1  ;;  %v245_v35 = vmul.f32 %v243_v32, %v1354_v0  ;;  %v341_v40 = vld [vmem:[%s1603_s6 + $0x10] sm:$0xff]  ;;  %v340_v41 = vld [vmem:[%s1603_s6 + $0x8] sm:$0xff]  ;;  %v339_v42 = vld [vmem:[%s1603_s6] sm:$0xff] }
  0x17   :  { %1147 = vmatpush3.msra.mxu0 %v250_v25  ;;  %v1467_v46 = vld [vmem:[%s1604_s7] sm:$0xf]  ;;  %v1014_v55 = vld [vmem:[%s1602_s5 + $0x38] sm:$0xff]  ;;  %v1013_v56 = vld [vmem:[%s1602_s5 + $0x30] sm:$0xff] }
  0x18   :  { %1131 = vmatmul.mubr.msk.f32.gmra.mxu0 %vm58_vm0, %v1389_v5  ;;  %1148 = vmatprep.subr.mxu0 %v249_v26  ;;  %v255_v47 = vrot.slane %v1467_v46, %v1462_v45  ;;  %v1012_v57 = vld [vmem:[%s1602_s5 + $0x28] sm:$0xff]  ;;  %v1011_v58 = vld [vmem:[%s1602_s5 + $0x20] sm:$0xff]  ;;  %v350_v60 = vrot.slane %v1467_v46, %v349_v59  ;;  %v451_v25 = vrot.slane %v1467_v46, 1 }
  0x19   :  { %1149 = vmatpush3.msra.mxu0 %v249_v26 }
  0x1a   :  { %1150 = vmatprep.subr.mxu0 %v248_v27 }
  0x1b   :  { %1151 = vmatpush3.msra.mxu0 %v248_v27 }
  0x1c   :  { %1174 = vmatprep.subr.mxu0 %v1298_v54 }
  0xd4   :  { %v1129_v8 = vpop.f32.mrf.mxu0 }
  0xd5   :  { %v143_v17 = vadd.f32 %v1129_v8, %v55_v11 }
  0xd6   :  { %v137_v9 = vpop.f32.mrf.mxu0 }
  0xd7   :  { %v138_v20 = vadd.f32 %v137_v9, %v54_v15  ;;  %v157_v22 = vmax.f32 %v143_v17, 0.0  ;;  %v1022_v17 = vld [vmem:[%s1603_s6 + $0x70] sm:$0xff] }
  0xd8   :  { %v1132_v12 = vpop.f32.mrf.mxu0 }
  0xd9   :  { %v153_v14 = vadd.f32 %v1132_v12, %v57_v10  ;;  %v156_v23 = vmax.f32 %v138_v20, 0.0  ;;  %v1019_v20 = vld [vmem:[%s1603_s6 + $0x58] sm:$0xff] }
  0xda   :  { %v147_v16 = vpop.f32.mrf.mxu0 }
  0xdb   :  { %v159_v18 = vmax.f32 %v153_v14, 0.0  ;;  %v148_v19 = vadd.f32 %v147_v16, %v56_v13  ;;  %v1023_v16 = vld [vmem:[%s1603_s6 + $0x78] sm:$0xff] }
  0xdd   :  { %v158_v21 = vmax.f32 %v148_v19, 0.0  ;;  %1133 = vmatprep.subr.mxu1 %v159_v18  ;;  %v1020_v19 = vld [vmem:[%s1603_s6 + $0x60] sm:$0xff] }
  0xde   :  { %1134 = vmatpush3.msra.mxu1 %v159_v18  ;;  %v1021_v18 = vld [vmem:[%s1603_s6 + $0x68] sm:$0xff] }
  0xdf   :  { %1135 = vmatprep.subr.mxu1 %v158_v21 }
  0xe0   :  { %1136 = vmatpush3.msra.mxu1 %v158_v21  ;;  %v1018_v21 = vld [vmem:[%s1603_s6 + $0x50] sm:$0xff] }
  0xe1   :  { %1137 = vmatprep.subr.mxu1 %v157_v22 }
  0xe2   :  { %1138 = vmatpush3.msra.mxu1 %v157_v22  ;;  %v1017_v22 = vld [vmem:[%s1603_s6 + $0x48] sm:$0xff] }
  0xe3   :  { %1139 = vmatprep.subr.mxu1 %v156_v23 }
  0xe4   :  { %1140 = vmatpush3.msra.mxu1 %v156_v23  ;;  %v1016_v23 = vld [vmem:[%s1603_s6 + $0x40] sm:$0xff] }
  0xe5   :  { %1142 = vmatmul.mubr.msk.f32.vlgmr.msra.gmra.mxu1 %vm160_vm1, %v1418_v24  ;;  %1155 = vmatprep.subr.mxu1 %v346_v28 }
  0xe6   :  { %1156 = vmatpush3.msra.mxu1 %v346_v28 }
  0xe7   :  { %1157 = vmatprep.subr.mxu1 %v345_v29 }
  0xe8   :  { %1158 = vmatpush3.msra.mxu1 %v345_v29 }
  0xe9   :  { %1159 = vmatprep.subr.mxu1 %v344_v30 }
  0xea   :  { %1160 = vmatpush3.msra.mxu1 %v344_v30  ;;  %v536_v30 = vrot.slane %v1467_v46, 3 }
  0xeb   :  { %1161 = vmatprep.subr.mxu1 %v343_v31 }
  0xec   :  { %1162 = vmatpush3.msra.mxu1 %v343_v31 }
  0xed   :  { %1163 = vmatprep.subr.mxu1 %v342_v39 }
  0xee   :  { %1164 = vmatpush3.msra.mxu1 %v342_v39 }
  0xef   :  { %1165 = vmatprep.subr.mxu1 %v341_v40 }
  0xf0   :  { %1166 = vmatpush3.msra.mxu1 %v341_v40  ;;  %v1029_v40 = vld [vmem:[%s1601_s4 + $0x38] sm:$0xff] }
  0xf1   :  { %1167 = vmatprep.subr.mxu1 %v340_v41 }
  0xf2   :  { %1168 = vmatpush3.msra.mxu1 %v340_v41 }
  0xf3   :  { %1169 = vmatprep.subr.mxu1 %v339_v42 }
  0xf4   :  { %1170 = vmatpush3.msra.mxu1 %v339_v42  ;;  %v1026_v42 = vld [vmem:[%s1601_s4 + $0x20] sm:$0xff] }
 0x1a5   :  { %v1143_v34 = vpop.f32.mrf.mxu1 }
 0x1a6   :  { %v247_v38 = vadd.f32 %v1143_v34, %v245_v35 }
 0x1a7   :  { %v233_v36 = vpop.f32.mrf.mxu1 }
 0x1a8   :  { %v246_v37 = vadd.f32 %v244_v33, %v233_v36 }
 0x1aa   :  { %1152 = vmatprep.mubr.msk.f32.mxu0 %vm160_vm1, %v246_v37 }
 0x1ab   :  { %1153 = vmatmul.mubr.msk.f32.vlgmr.msra.gmra.mxu0 %vm160_vm1, %v247_v38 }
 0x1ac   :  { %1175 = vmatpush3.msra.mxu0 %v1014_v55  ;;  %1182 = vmatprep.mubr.msk.f32.mxu0 %vm1299_vm3, %v1298_v54  ;;  %v1037_v55 = vld [vmem:[%s1602_s5 + $0x40] sm:$0xff] }
 0x1ad   :  { %1176 = vmatprep.subr.mxu0 %v1298_v54 }
 0x1ae   :  { %1177 = vmatpush3.msra.mxu0 %v1013_v56  ;;  %v1049_v56 = vld [vmem:[%s1603_s6 + $0xb0] sm:$0xff] }
 0x1af   :  { %1178 = vmatprep.subr.mxu0 %v1298_v54 }
 0x1b0   :  { %1179 = vmatpush3.msra.mxu0 %v1012_v57  ;;  %v1048_v57 = vld [vmem:[%s1603_s6 + $0xa8] sm:$0xff] }
 0x1b1   :  { %1180 = vmatprep.subr.mxu0 %v1298_v54 }
 0x1b2   :  { %1181 = vmatpush3.msra.mxu0 %v1011_v58  ;;  %v1047_v58 = vld [vmem:[%s1603_s6 + $0xa0] sm:$0xff] }
 0x1b3   :  { %1185 = vmatprep.subr.mxu0 %v1298_v54 }
 0x26b   :  { %v1154_v48 = vpop.f32.mrf.mxu0 }
 0x26c   :  { %v334_v49 = vadd.f32 %v1154_v48, %v255_v47 }
 0x26d   :  { %v328_v50 = vpop.f32.mrf.mxu0 }
 0x26e   :  { %v329_v51 = vadd.f32 %v328_v50, %v255_v47  ;;  %v338_v53 = vmax.f32 %v334_v49, 0.0 }
 0x270   :  { %v337_v52 = vmax.f32 %v329_v51, 0.0 }
 0x272   :  { %1171 = vmatprep.mubr.msk.f32.mxu1 %vm351_vm2, %v337_v52 }
 0x273   :  { %1172 = vmatmul.mubr.msk.f32.vlgmr.msra.gmra.mxu1 %vm351_vm2, %v338_v53  ;;  %v1039_v53 = vld [vmem:[%s1602_s5 + $0x50] sm:$0xff] }
 0x274   :  { %1222 = vmatprep.mubr.msk.f32.mxu1 %vm160_vm1, %v1396_v6 }
 0x333   :  { %v1173_v61 = vpop.f32.mrf.mxu1 }
 0x334   :  { %v430_v62 = vadd.f32 %v1173_v61, %v350_v60 }
 0x335   :  { %v424_v63 = vpop.f32.mrf.mxu1 }
 0x336   :  { %v434_v0 = vmax.f32 %v430_v62, 0.0  ;;  %v425_v1 = vadd.f32 %v424_v63, %v350_v60  ;;  %v791_v60 = vstv %s1036_s26 }
 0x338   :  { %v433_v6 = vmax.f32 %v425_v1, 0.0  ;;  %v436_v7 = vsel %vm160_vm1, %v434_v0, 0.0 }
 0x33a   :  { %v435_v8 = vsel %vm160_vm1, %v433_v6, 0.0 }
 0x33b   :  { %v437_v9 = vadd.f32 %v436_v7, %v435_v8  ;;  %v1046_v7 = vld [vmem:[%s1603_s6 + $0x98] sm:$0xff]  ;;  %v1045_v8 = vld [vmem:[%s1603_s6 + $0x90] sm:$0xff] }
 0x33d   :  { %v438_v10 = vrot.slane %v437_v9, 4 }
 0x33f   :  { %v439_v11 = vadd.f32 %v438_v10, %v437_v9  ;;  %v1044_v9 = vld [vmem:[%s1603_s6 + $0x88] sm:$0xff]  ;;  %v1043_v10 = vld [vmem:[%s1603_s6 + $0x80] sm:$0xff] }
 0x341   :  { %v440_v12 = vrot.slane %v439_v11, 2 }
 0x343   :  { %v441_v13 = vadd.f32 %v440_v12, %v439_v11  ;;  %v1025_v11 = vld [vmem:[%s1604_s7 + $0x4] sm:$0xf] }
 0x344   :  { %v804_v12 = vrot.slane %v1025_v11, %v1462_v45 }
 0x345   :  { %v442_v14 = vrot.slane %v441_v13, 1 }
 0x347   :  { %v443_v15 = vadd.f32 %v442_v14, %v441_v13 }
 0x349   :  { %1183 = vmatmul.mubr.msk.f32.vlgmr.msra.gmra.mxu0 %vm160_vm1, %v443_v15 }
 0x34a   :  { %1186 = vmatpush3.msra.mxu0 %v1023_v16  ;;  %1201 = vmatprep.mubr.msk.f32.mxu0 %vm1299_vm3, %v1298_v54 }
 0x34b   :  { %1187 = vmatprep.subr.mxu0 %v1298_v54 }
 0x34c   :  { %1188 = vmatpush3.msra.mxu0 %v1022_v17 }
 0x34d   :  { %1189 = vmatprep.subr.mxu0 %v1298_v54 }
 0x34e   :  { %1190 = vmatpush3.msra.mxu0 %v1021_v18 }
 0x34f   :  { %1191 = vmatprep.subr.mxu0 %v1298_v54 }
 0x350   :  { %1192 = vmatpush3.msra.mxu0 %v1020_v19  ;;  %v900_v19 = vrot.slane %v1025_v11, %v349_v59 }
 0x351   :  { %1193 = vmatprep.subr.mxu0 %v1298_v54 }
 0x352   :  { %1194 = vmatpush3.msra.mxu0 %v1019_v20 }
 0x353   :  { %1195 = vmatprep.subr.mxu0 %v1298_v54 }
 0x354   :  { %1196 = vmatpush3.msra.mxu0 %v1018_v21 }
 0x355   :  { %1197 = vmatprep.subr.mxu0 %v1298_v54 }
 0x356   :  { %1198 = vmatpush3.msra.mxu0 %v1017_v22 }
 0x357   :  { %1199 = vmatprep.subr.mxu0 %v1298_v54  ;;  %v1038_v54 = vld [vmem:[%s1602_s5 + $0x48] sm:$0xff] }
 0x358   :  { %1200 = vmatpush3.msra.mxu0 %v1016_v23 }
 0x409   :  { %v522_v26 = vpop.f32.mrf.mxu0 }
 0x40a   :  { %v523_v27 = vadd.f32 %v522_v26, %v451_v25 }
 0x40b   :  { %v1184_v28 = vpop.f32.mrf.mxu0 }
 0x40c   :  { %v526_v29 = vmax.f32 %v523_v27, 0.0 }
 0x40e   :  { %1202 = vmatmul.mubr.msk.f32.vlgmr.msra.gmra.mxu0 %vm351_vm2, %v526_v29 }
 0x40f   :  { %1208 = vmatprep.mubr.msk.f32.mxu0 %vm58_vm0, %v1364_v2  ;;  %v1040_v2 = vld [vmem:[%s1602_s5 + $0x58] sm:$0xff] }
 0x4ce   :  { %v607_v31 = vpop.f32.mrf.mxu0 }
 0x4cf   :  { %v608_v32 = vadd.f32 %v607_v31, %v536_v30 }
 0x4d0   :  { %v1203_v33 = vpop.f32.mrf.mxu0 }
 0x4d1   :  { %v611_v34 = vmax.f32 %v608_v32, 0.0 }
 0x4d3   :  { %v618_v35 = vrot.slane %v611_v34, %v1462_v45 }
 0x4d5   :  { %v620_v36 = vadd.f32 %v618_v35, %v434_v0  ;;  %v619_v37 = vadd.f32 %v618_v35, %v433_v6 }
 0x4d7   :  { %1204 = vmatprep.subr.mxu0 %v620_v36  ;;  %v792_v62 = vmul.f32 %v791_v60, %v619_v37  ;;  %v793_v63 = vmul.f32 %v791_v60, %v620_v36 }
 0x4d8   :  { %1205 = vmatpush3.msra.mxu0 %v620_v36 }
 0x4d9   :  { %1206 = vmatprep.subr.mxu0 %v619_v37 }
 0x4da   :  { %1207 = vmatpush3.msra.mxu0 %v619_v37 }
 0x4db   :  { %1209 = vmatmul.mubr.msk.f32.vlgmr.msra.gmra.mxu0 %vm58_vm0, %v1373_v3  ;;  %1225 = vmatprep.subr.mxu0 %v1040_v2  ;;  %v1027_v3 = vld [vmem:[%s1601_s4 + $0x28] sm:$0xff] }
 0x4dc   :  { %1211 = vmatprep.mubr.msk.f32.mxu0 %vm58_vm0, %v1379_v4  ;;  %1226 = vmatpush3.msra.mxu0 %v1040_v2 }
 0x4dd   :  { %1227 = vmatprep.subr.mxu0 %v1039_v53 }
 0x4de   :  { %1228 = vmatpush3.msra.mxu0 %v1039_v53 }
 0x4df   :  { %1212 = vmatmul.mubr.msk.f32.gmra.mxu0 %vm58_vm0, %v1389_v5  ;;  %v1028_v5 = vld [vmem:[%s1601_s4 + $0x30] sm:$0xff]  ;;  %1229 = vmatprep.subr.mxu0 %v1038_v54 }
 0x4e0   :  { %1230 = vmatpush3.msra.mxu0 %v1038_v54 }
 0x4e1   :  { %1231 = vmatprep.subr.mxu0 %v1037_v55 }
 0x4e2   :  { %1232 = vmatpush3.msra.mxu0 %v1037_v55 }
 0x59b   :  { %v1210_v38 = vpop.f32.mrf.mxu0 }
 0x59c   :  { %v698_v46 = vadd.f32 %v1210_v38, %v1027_v3 }
 0x59d   :  { %v692_v39 = vpop.f32.mrf.mxu0 }
 0x59e   :  { %v693_v49 = vadd.f32 %v1026_v42, %v692_v39  ;;  %v712_v51 = vmax.f32 %v698_v46, 0.0 }
 0x59f   :  { %v1213_v4 = vpop.f32.mrf.mxu0 }
 0x5a0   :  { %v708_v41 = vadd.f32 %v1213_v4, %v1029_v40  ;;  %v711_v52 = vmax.f32 %v693_v49, 0.0 }
 0x5a1   :  { %v702_v43 = vpop.f32.mrf.mxu0 }
 0x5a2   :  { %v714_v47 = vmax.f32 %v708_v41, 0.0  ;;  %v703_v48 = vadd.f32 %v1028_v5, %v702_v43 }
 0x5a4   :  { %v713_v50 = vmax.f32 %v703_v48, 0.0  ;;  %1214 = vmatprep.subr.mxu1 %v714_v47 }
 0x5a5   :  { %1215 = vmatpush3.msra.mxu1 %v714_v47 }
 0x5a6   :  { %1216 = vmatprep.subr.mxu1 %v713_v50 }
 0x5a7   :  { %1217 = vmatpush3.msra.mxu1 %v713_v50 }
 0x5a8   :  { %1218 = vmatprep.subr.mxu1 %v712_v51 }
 0x5a9   :  { %1219 = vmatpush3.msra.mxu1 %v712_v51 }
 0x5aa   :  { %1220 = vmatprep.subr.mxu1 %v711_v52 }
 0x5ab   :  { %1221 = vmatpush3.msra.mxu1 %v711_v52 }
 0x5ac   :  { %1223 = vmatmul.mubr.msk.f32.vlgmr.msra.gmra.mxu1 %vm160_vm1, %v1418_v24  ;;  %v1050_v24 = vld [vmem:[%s1603_s6 + $0xb8] sm:$0xff]  ;;  %s1300_s6 = smov [#allocation5]  }
 0x5ad   :  { %1236 = vmatprep.subr.mxu1 %v1050_v24  ;;  %s989_s14 = sshll.u32 %s1300_s6, 4  ;;  %s990_s14 = int_to_ptr.vmem [resolvable:$true] %s989_s14 }
 0x5ae   :  { %1237 = vmatpush3.msra.mxu1 %v1050_v24  ;;  %s1273_s7 = scalar_lea.vmem %s990_s14, 256  ;;  %p1278_p6 = scmp.lt.s32.totalorder %s990_s14, %s990_s14 }
 0x5af   :  { %1238 = vmatprep.subr.mxu1 %v1049_v56  ;;  %p1274_p5 = scmp.ne.s32.totalorder %s990_s14, %s1273_s7  ;;  %p1279_p7 = scmp.lt.s32.totalorder %s1273_s7, %s1273_s7 }
 0x5b0   :  { %1239 = vmatpush3.msra.mxu1 %v1049_v56 }
 0x5b1   :  { %1240 = vmatprep.subr.mxu1 %v1048_v57  ;;  %p1280_p8 = por %p1279_p7, %p1278_p6 }
 0x5b2   :  { %1241 = vmatpush3.msra.mxu1 %v1048_v57 }
 0x5b3   :  { %1242 = vmatprep.subr.mxu1 %v1047_v58  ;;  %p1281_p9 = pnand %p1280_p8, %p1274_p5 }
 0x5b4   :  { %1243 = vmatpush3.msra.mxu1 %v1047_v58 }
 0x5b5   :  { %1244 = vmatprep.subr.mxu1 %v1046_v7 }
 0x5b6   :  { %1245 = vmatpush3.msra.mxu1 %v1046_v7 }
 0x5b7   :  { %1246 = vmatprep.subr.mxu1 %v1045_v8 }
 0x5b8   :  { %1247 = vmatpush3.msra.mxu1 %v1045_v8 }
 0x5b9   :  { %1248 = vmatprep.subr.mxu1 %v1044_v9 }
 0x5ba   :  { %1249 = vmatpush3.msra.mxu1 %v1044_v9 }
 0x5bb   :  { %1250 = vmatprep.subr.mxu1 %v1043_v10 }
 0x5bc   :  { %1251 = vmatpush3.msra.mxu1 %v1043_v10 }
 0x66c   :  { %v1224_v61 = vpop.f32.mrf.mxu1 }
 0x66d   :  { %v795_v6 = vadd.f32 %v1224_v61, %v793_v63 }
 0x66e   :  { %v781_v0 = vpop.f32.mrf.mxu1 }
 0x66f   :  { %v794_v1 = vadd.f32 %v792_v62, %v781_v0 }
 0x671   :  { %1233 = vmatprep.mubr.msk.f32.mxu0 %vm160_vm1, %v794_v1 }
 0x672   :  { %1234 = vmatmul.mubr.msk.f32.vlgmr.msra.gmra.mxu0 %vm160_vm1, %v795_v6 }
 0x732   :  { %v1235_v13 = vpop.f32.mrf.mxu0 }
 0x733   :  { %v883_v14 = vadd.f32 %v1235_v13, %v804_v12 }
 0x734   :  { %v877_v15 = vpop.f32.mrf.mxu0 }
 0x735   :  { %v878_v16 = vadd.f32 %v877_v15, %v804_v12  ;;  %v887_v18 = vmax.f32 %v883_v14, 0.0 }
 0x737   :  { %v886_v17 = vmax.f32 %v878_v16, 0.0 }
 0x739   :  { %1252 = vmatprep.mubr.msk.f32.mxu1 %vm351_vm2, %v886_v17 }
 0x73a   :  { %1253 = vmatmul.mubr.msk.f32.vlgmr.msra.gmra.mxu1 %vm351_vm2, %v887_v18 }
 0x7fa   :  { %v1254_v20 = vpop.f32.mrf.mxu1 }
 0x7fb   :  { %v979_v21 = vadd.f32 %v1254_v20, %v900_v19 }
 0x7fc   :  { %v973_v22 = vpop.f32.mrf.mxu1 }
 0x7fd   :  { %983 = vst.msk [vmem:[#allocation5 + $0x8] sm:$0xff] %vm160_vm1, %v979_v21  ;;  %v974_v45 = vadd.f32 %v973_v22, %v900_v19 }
 0x7ff   :  { %982 = vst.msk [vmem:[#allocation5] sm:$0xff] %vm160_vm1, %v974_v45 }
 0x800   :  { %1284 = shalt.err (!%p1281_p9)
}
 0x801   :  { %s1301_s3 = smov 128   ;;  %s1302_s15 = smov 8  }
 0x802   :  { %995 = dma.vmem_to_hbm [thread:$0]  %s990_s14, 256, %s1605_s8, [#allocation3], %s1301_s3, %s1301_s3, %s1302_s15  }
 0x803   :  { %1295 = dma.done.wait [#allocation3], 256  }
 0x804   :  { %1296 = vsyncadd [#allocation3], 4294967040 }
 0x805   :  { %999 = vsyncpa [#allocation3], 1 }
 0x806   :  { %1000 = vsyncpa [#allocation4], 1 }

</bundles_post_ra>
